<compile_context>
chip_gen: v7x
topology: tpu7x:2x2x1
jax: 0.10.0
libtpu: 0.0.40
codegen_flags: <defaults>
</compile_context>

<pallas_src>
import functools
import math

import jax
import jax.numpy as jnp
from jax.experimental import pallas as pl
from jax.experimental.pallas import tpu as pltpu


def _round_up(x, m):
    return ((x + m - 1) // m) * m


def _pad_lanes(n):
    """Minor (lane) dim padding of a VMEM buffer / value."""
    return _round_up(max(int(n), 1), 128)


def _fusion_kernel(*refs, dims):
    """Fuse all modalities for one batch tile entirely as values.

    refs = (x_0, ..., x_{K-1}, o); x_k: (TB, D_k), o: (TB, W), W = prod(D_k+1).

    The fused tensor is built right-to-left: starting from xc_{K-1} = [1, x_{K-1}],
    folding modality k produces the lane-concatenation of
        block_0 = tail                       (xc_k[:, 0] == 1)
        block_i = x_k[:, i-1] * tail         (i = 1..D_k)
    so that new_tail[:, i*width + j] = xc_k[:, i] * tail[:, j] (later modalities
    fastest), matching the torch einsum+reshape chain.  All cross-lane work
    (broadcasts, concat placement) happens on values; the only store is one
    dense full-width write at the end of the tile.
    """
    x_refs = refs[:-1]
    o_ref = refs[-1]
    dtype = o_ref.dtype
    tb = o_ref.shape[0]

    ones = jnp.ones((tb, 1), dtype=dtype)

    # Seed: xc_{K-1} = [1, x_{K-1}]  (single concat, no store).
    tail = jnp.concatenate([ones, x_refs[-1][...]], axis=1)

    # Fold the remaining modalities in, right to left.  dims are small
    # compile-time constants, so these Python loops are short static unrolls.
    for k in range(len(dims) - 2, -1, -1):
        xk = x_refs[k][...]                        # (TB, D_k)
        blocks = [tail]                            # i == 0 -> the prepended 1
        for i in range(dims[k]):
            blocks.append(xk[:, i:i + 1] * tail)   # broadcast-multiply (value)
        tail = jnp.concatenate(blocks, axis=1)

    # One dense, lane-aligned, full-width store per tile.
    o_ref[...] = tail.astype(dtype)


def tensor_fusion(modalities):
    """JAX/Pallas equivalent of TensorFusion.forward.

    modalities: list of arrays, each (*nonfeature, D_k), identical nonfeature
    dims and dtype.  Returns (*nonfeature, prod_k (D_k + 1)).
    """
    modalities = list(modalities)
    if len(modalities) == 1:
        return modalities[0]

    nonfeature = modalities[0].shape[:-1]
    batch = int(math.prod(nonfeature)) if nonfeature else 1
    dims = tuple(int(m.shape[-1]) for m in modalities)
    out_width = 1
    for d in dims:
        out_width *= d + 1
    dtype = modalities[0].dtype
    itemsize = jnp.dtype(dtype).itemsize

    # Free reshapes only (no transposes / concats in the wrapper).
    flats = [m.reshape(batch, d) for m, d in zip(modalities, dims)]

    # --- batch-tile sizing: budget the whole pipelined working set ---------
    # dtype-aware sublane multiple (sub-32-bit dtypes pack along sublanes).
    sublane = {4: 8, 2: 16, 1: 32}.get(itemsize, 8)

    # Per-row byte estimate (lane-padded):
    #   2x double-buffered output block + 2x double-buffered input blocks
    #   + peak in-kernel value footprint across fold levels
    #     ((D_k + 2) tail-width blocks live for the concat + its result).
    out_row = _pad_lanes(out_width) * itemsize
    in_rows = sum(_pad_lanes(d) * itemsize for d in dims)
    peak_vals_row = 0
    w = dims[-1] + 1
    for k in range(len(dims) - 2, -1, -1):
        level = (dims[k] + 2) * _pad_lanes(w) + _pad_lanes(w * (dims[k] + 1))
        peak_vals_row = max(peak_vals_row, level)
        w *= dims[k] + 1
    peak_vals_row *= itemsize
    row_bytes = 2 * out_row + 2 * in_rows + peak_vals_row

    working_set_budget = 20 * 1024 * 1024  # safe on v5e/v6e/v7x
    tb = working_set_budget // max(row_bytes, 1)
    tb = (tb // sublane) * sublane
    tb = min(tb, 8192)
    # Guarantee >= 2 grid steps whenever the batch allows, so both v7x
    # TensorCores get work under dimension_semantics=("parallel",).
    tb = min(tb, _round_up(pl.cdiv(batch, 2), sublane))
    tb = max(tb, sublane)
    grid = (pl.cdiv(batch, tb),)

    kernel = functools.partial(_fusion_kernel, dims=dims)

    in_specs = [pl.BlockSpec((tb, d), lambda i: (i, 0)) for d in dims]
    out_spec = pl.BlockSpec((tb, out_width), lambda i: (i, 0))

    out = pl.pallas_call(
        kernel,
        out_shape=jax.ShapeDtypeStruct((batch, out_width), dtype),
        grid=grid,
        in_specs=in_specs,
        out_specs=out_spec,
        compiler_params=pltpu.CompilerParams(
            dimension_semantics=("parallel",),
            vmem_limit_bytes=32 * 1024 * 1024),
    )(*flats)

    return out.reshape(*nonfeature, out_width)


def _reference(modalities):
    """Pure-JAX reference mirroring the PyTorch code exactly."""
    if len(modalities) == 1:
        return modalities[0]
    mod0 = modalities[0]
    nonfeature = mod0.shape[:-1]
    m = jnp.concatenate([jnp.ones(nonfeature + (1,), mod0.dtype), mod0], axis=-1)
    for mod in modalities[1:]:
        modc = jnp.concatenate(
            [jnp.ones(nonfeature + (1,), mod.dtype), mod], axis=-1)
        fused = jnp.einsum('...i,...j->...ij', m, modc)
        m = fused.reshape(*nonfeature, -1)
    return m


if __name__ == "__main__":
    key = jax.random.PRNGKey(0)
    k0, k1, k2, k3, k4, k5, k6, k7 = jax.random.split(key, 8)

    # Small example consistent with the module: 3 modalities, batch=2.
    batch = 2
    mods = [jax.random.normal(k0, (batch, 8), jnp.float32),
            jax.random.normal(k1, (batch, 6), jnp.float32),
            jax.random.normal(k2, (batch, 4), jnp.float32)]
    out = jax.block_until_ready(tensor_fusion(mods))
    ref = _reference(mods)
    assert out.shape == (batch, 9 * 7 * 5), out.shape
    assert jnp.allclose(out, ref, atol=1e-5, rtol=1e-5), "mismatch vs reference"

    # Multi-dim nonfeature axes (flattened inside the wrapper).
    mods2 = [jax.random.normal(k3, (2, 3, 8), jnp.float32),
             jax.random.normal(k4, (2, 3, 6), jnp.float32),
             jax.random.normal(k5, (2, 3, 4), jnp.float32)]
    out2 = jax.block_until_ready(tensor_fusion(mods2))
    ref2 = _reference(mods2)
    assert out2.shape == (2, 3, 315), out2.shape
    assert jnp.allclose(out2, ref2, atol=1e-5, rtol=1e-5), "mismatch (3D) vs reference"

    # Larger batch exercising a multi-step grid and a partial last block.
    big = 1030
    modsb = [jax.random.normal(k6, (big, 8), jnp.float32),
             jax.random.normal(k7, (big, 6), jnp.float32)]
    outb = jax.block_until_ready(tensor_fusion(modsb))
    refb = _reference(modsb)
    assert outb.shape == (big, 9 * 7), outb.shape
    assert jnp.allclose(outb, refb, atol=1e-5, rtol=1e-5), "mismatch (big batch) vs reference"

    # Single-modality passthrough path (matches the PyTorch K=1 behavior).
    single = tensor_fusion([mods[0]])
    assert jnp.array_equal(single, mods[0])

    print("KERNEL_OK")
</pallas_src>

<mosaic_0001>
module attributes {stable_mosaic.version = 11 : i64} {
  func.func @_fusion_kernel(%arg0: i32, %arg1: memref<8x8xf32, #tpu.memory_space<vmem>>, %arg2: memref<8x6xf32, #tpu.memory_space<vmem>>, %arg3: memref<8x4xf32, #tpu.memory_space<vmem>>, %arg4: memref<8x315xf32, #tpu.memory_space<vmem>>) attributes {dimension_semantics = [#tpu.dimension_semantics<parallel>], iteration_bounds = array<i64: 1>, scalar_prefetch = 0 : i64, scratch_operands = 0 : i64, tpu.core_type = #tpu.core_type<tc>, window_params = [{transform_indices = @transform_0, window_bounds = array<i64: 8, 8>}, {transform_indices = @transform_1, window_bounds = array<i64: 8, 6>}, {transform_indices = @transform_2, window_bounds = array<i64: 8, 4>}, {transform_indices = @transform_3, window_bounds = array<i64: 8, 315>}]} {
    %cst = arith.constant 1.000000e+00 : f32
    %0 = vector.broadcast %cst : f32 to vector<8x1xf32>
    %c0 = arith.constant 0 : index
    %c0_0 = arith.constant 0 : index
    %1 = vector.load %arg3[%c0, %c0_0] : memref<8x4xf32, #tpu.memory_space<vmem>>, vector<8x4xf32>
    %2 = tpu.concatenate %0, %1 in 1 : vector<8x1xf32>, vector<8x4xf32> -> vector<8x5xf32>
    %c0_1 = arith.constant 0 : index
    %c0_2 = arith.constant 0 : index
    %3 = vector.load %arg2[%c0_1, %c0_2] : memref<8x6xf32, #tpu.memory_space<vmem>>, vector<8x6xf32>
    %4 = vector.extract_strided_slice %3 {offsets = [0, 0], sizes = [8, 1], strides = [1, 1]} : vector<8x6xf32> to vector<8x1xf32>
    %5 = vector.broadcast %4 : vector<8x1xf32> to vector<8x5xf32>
    %6 = arith.mulf %5, %2 : vector<8x5xf32>
    %7 = vector.extract_strided_slice %3 {offsets = [0, 1], sizes = [8, 1], strides = [1, 1]} : vector<8x6xf32> to vector<8x1xf32>
    %8 = vector.broadcast %7 : vector<8x1xf32> to vector<8x5xf32>
    %9 = arith.mulf %8, %2 : vector<8x5xf32>
    %10 = vector.extract_strided_slice %3 {offsets = [0, 2], sizes = [8, 1], strides = [1, 1]} : vector<8x6xf32> to vector<8x1xf32>
    %11 = vector.broadcast %10 : vector<8x1xf32> to vector<8x5xf32>
    %12 = arith.mulf %11, %2 : vector<8x5xf32>
    %13 = vector.extract_strided_slice %3 {offsets = [0, 3], sizes = [8, 1], strides = [1, 1]} : vector<8x6xf32> to vector<8x1xf32>
    %14 = vector.broadcast %13 : vector<8x1xf32> to vector<8x5xf32>
    %15 = arith.mulf %14, %2 : vector<8x5xf32>
    %16 = vector.extract_strided_slice %3 {offsets = [0, 4], sizes = [8, 1], strides = [1, 1]} : vector<8x6xf32> to vector<8x1xf32>
    %17 = vector.broadcast %16 : vector<8x1xf32> to vector<8x5xf32>
    %18 = arith.mulf %17, %2 : vector<8x5xf32>
    %19 = vector.extract_strided_slice %3 {offsets = [0, 5], sizes = [8, 1], strides = [1, 1]} : vector<8x6xf32> to vector<8x1xf32>
    %20 = vector.broadcast %19 : vector<8x1xf32> to vector<8x5xf32>
    %21 = arith.mulf %20, %2 : vector<8x5xf32>
    %22 = tpu.concatenate %2, %6, %9, %12, %15, %18, %21 in 1 : vector<8x5xf32>, vector<8x5xf32>, vector<8x5xf32>, vector<8x5xf32>, vector<8x5xf32>, vector<8x5xf32>, vector<8x5xf32> -> vector<8x35xf32>
    %c0_3 = arith.constant 0 : index
    %c0_4 = arith.constant 0 : index
    %23 = vector.load %arg1[%c0_3, %c0_4] : memref<8x8xf32, #tpu.memory_space<vmem>>, vector<8x8xf32>
    %24 = vector.extract_strided_slice %23 {offsets = [0, 0], sizes = [8, 1], strides = [1, 1]} : vector<8x8xf32> to vector<8x1xf32>
    %25 = vector.broadcast %24 : vector<8x1xf32> to vector<8x35xf32>
    %26 = arith.mulf %25, %22 : vector<8x35xf32>
    %27 = vector.extract_strided_slice %23 {offsets = [0, 1], sizes = [8, 1], strides = [1, 1]} : vector<8x8xf32> to vector<8x1xf32>
    %28 = vector.broadcast %27 : vector<8x1xf32> to vector<8x35xf32>
    %29 = arith.mulf %28, %22 : vector<8x35xf32>
    %30 = vector.extract_strided_slice %23 {offsets = [0, 2], sizes = [8, 1], strides = [1, 1]} : vector<8x8xf32> to vector<8x1xf32>
    %31 = vector.broadcast %30 : vector<8x1xf32> to vector<8x35xf32>
    %32 = arith.mulf %31, %22 : vector<8x35xf32>
    %33 = vector.extract_strided_slice %23 {offsets = [0, 3], sizes = [8, 1], strides = [1, 1]} : vector<8x8xf32> to vector<8x1xf32>
    %34 = vector.broadcast %33 : vector<8x1xf32> to vector<8x35xf32>
    %35 = arith.mulf %34, %22 : vector<8x35xf32>
    %36 = vector.extract_strided_slice %23 {offsets = [0, 4], sizes = [8, 1], strides = [1, 1]} : vector<8x8xf32> to vector<8x1xf32>
    %37 = vector.broadcast %36 : vector<8x1xf32> to vector<8x35xf32>
    %38 = arith.mulf %37, %22 : vector<8x35xf32>
    %39 = vector.extract_strided_slice %23 {offsets = [0, 5], sizes = [8, 1], strides = [1, 1]} : vector<8x8xf32> to vector<8x1xf32>
    %40 = vector.broadcast %39 : vector<8x1xf32> to vector<8x35xf32>
    %41 = arith.mulf %40, %22 : vector<8x35xf32>
    %42 = vector.extract_strided_slice %23 {offsets = [0, 6], sizes = [8, 1], strides = [1, 1]} : vector<8x8xf32> to vector<8x1xf32>
    %43 = vector.broadcast %42 : vector<8x1xf32> to vector<8x35xf32>
    %44 = arith.mulf %43, %22 : vector<8x35xf32>
    %45 = vector.extract_strided_slice %23 {offsets = [0, 7], sizes = [8, 1], strides = [1, 1]} : vector<8x8xf32> to vector<8x1xf32>
    %46 = vector.broadcast %45 : vector<8x1xf32> to vector<8x35xf32>
    %47 = arith.mulf %46, %22 : vector<8x35xf32>
    %48 = tpu.concatenate %22, %26, %29, %32, %35, %38, %41, %44, %47 in 1 : vector<8x35xf32>, vector<8x35xf32>, vector<8x35xf32>, vector<8x35xf32>, vector<8x35xf32>, vector<8x35xf32>, vector<8x35xf32>, vector<8x35xf32>, vector<8x35xf32> -> vector<8x315xf32>
    %c0_5 = arith.constant 0 : index
    %c0_6 = arith.constant 0 : index
    %49 = vector.load %arg4[%c0_5, %c0_6] : memref<8x315xf32, #tpu.memory_space<vmem>>, vector<8x315xf32>
    tpu.vector_store %arg4[%c0_5, %c0_6], %48 {strides = array<i32>} : memref<8x315xf32, #tpu.memory_space<vmem>>, vector<8x315xf32>,
    return
  }
  func.func @transform_0(%arg0: i32) -> (i32, i32) {
    %c0_i32 = arith.constant 0 : i32
    %c0_i32_0 = arith.constant 0 : i32
    return %arg0, %c0_i32 : i32, i32
  }
  func.func @transform_1(%arg0: i32) -> (i32, i32) {
    %c0_i32 = arith.constant 0 : i32
    %c0_i32_0 = arith.constant 0 : i32
    return %arg0, %c0_i32 : i32, i32
  }
  func.func @transform_2(%arg0: i32) -> (i32, i32) {
    %c0_i32 = arith.constant 0 : i32
    %c0_i32_0 = arith.constant 0 : i32
    return %arg0, %c0_i32 : i32, i32
  }
  func.func @transform_3(%arg0: i32) -> (i32, i32) {
    %c0_i32 = arith.constant 0 : i32
    %c0_i32_0 = arith.constant 0 : i32
    return %arg0, %c0_i32 : i32, i32
  }
}

</mosaic_0001>

<bundles_post_ra>
// kernel: tpu_custom_call.1
= control target key start
LH: loop header
LB: loop body
LE: loop exit
PB: predicated region body
PF: predicated region fallthrough
CT: control target
= control target key end

     0   :  { %8 = vsyncpa [#allocation3], 0  ;;  %s434_s0 = inlined_call_operand.hbm [shape: f32[2,8], index: 0, kind: input, shape index: {}]   ;;  %s435_s1 = inlined_call_operand.vmem [shape: f32[2,6], index: 1, kind: input, shape index: {}]   ;;  %s436_s2 = inlined_call_operand.vmem [shape: f32[2,4], index: 2, kind: input, shape index: {}]   ;;  %s437_s3 = inlined_call_operand.hbm [shape: f32[2,315], index: 3, kind: output, shape index: {}]  }
   0x1   :  { %9 = vsyncpa [#allocation4], 0 }
   0x2   :  { %14 = vsyncadd [#allocation3], 96  ;;  %s354_s12 = smov [#allocation2]   ;;  %s306_s16 = scalar_lea.hbm %s434_s0, 32 }
   0x3   :  { %s15_s13 = sshll.u32 %s354_s12, 4  ;;  %p307_p0 = scmp.ne.s32.totalorder %s434_s0, %s306_s16  ;;  %s16_s13 = int_to_ptr.vmem [resolvable:$true] %s15_s13 }
   0x4   :  { %p310_p1 = scmp.lt.u32.totalorder %s306_s16, %s434_s0 }
   0x6   :  { %p312_p2 = pnand %p310_p1, %p307_p0 }
   0x8   :  { %315 = shalt.err (!%p312_p2)
}
   0x9   :  { %s316_s21 = scalar_lea.vmem %s16_s13, 32  ;;  %s320_s22 = scalar_lea.vmem %s16_s13, 128 }
   0xa   :  { %p317_p3 = scmp.ne.s32.totalorder %s16_s13, %s316_s21  ;;  %p321_p4 = scmp.lt.s32.totalorder %s16_s13, %s16_s13 }
   0xb   :  { %p322_p5 = scmp.lt.s32.totalorder %s320_s22, %s316_s21 }
   0xd   :  { %p323_p6 = por %p322_p5, %p321_p4 }
   0xf   :  { %p324_p7 = pnand %p323_p6, %p317_p3 }
  0x11   :  { %327 = shalt.err (!%p324_p7)
}
  0x12   :  { %s355_s23 = smov 32   ;;  %s356_s24 = smov 2  }
  0x13   :  { %21 = dma.hbm_to_vmem [thread:$0]  %s434_s0, 32, %s16_s13, [#allocation3], %s355_s23, %s355_s23, %s356_s24  }
  0x14   :  { %350 = dma.done.wait [#allocation3], 128  }
  0x15   :  { %351 = vsyncadd [#allocation3], 4294967168  ;;  %v357_v0 = vmov 2   ;;  %v358_v1 = vmov 0   ;;  %v36_v2 = vld [vmem:[%s435_s1] sm:$0xff]  ;;  %v359_v3 = vmov 3   ;;  %v203_v59 = vlaneseq }
  0x16   :  { %294 = vset.pattern.permute.xlu1 %v357_v0  ;;  %292 = vset.pattern.permute.xlu0 %v358_v1  ;;  %v360_v4 = vmov 1   ;;  %v361_v5 = vmov 4   ;;  %v362_v6 = vmov 5   ;;  %v29_v7 = vld [vmem:[%s436_s2] sm:$0xff]  ;;  %s363_s1 = smov 1   ;;  %v364_v9 = vmov 7  }
  0x17   :  { %49 = vperm.xlu1 %294, %v36_v2   ;;  %39 = vperm.xlu0 %292, %v36_v2   ;;  %v104_v8 = vld [vmem:[#allocation2] sm:$0xff]  ;;  %v365_v10 = vmov 6   ;;  %vm34_vm0 = vcmask 7168   ;;  %s366_s2 = smov 30   ;;  %s367_s30 = smov 5   ;;  %vm92_vm1 = vcmask 39936  }
  0x18   :  { %s368_s4 = smov 10   ;;  %s369_s5 = smov 15   ;;  %vm94_vm2 = vcmask 80896   ;;  %vm96_vm3 = vcmask 121856   ;;  %vm98_vm4 = vcmask 162816   ;;  %vm100_vm5 = vcmask 203776  }
  0x19   :  { %s370_s6 = smov 20   ;;  %s371_s7 = smov 25   ;;  %vm102_vm6 = vcmask 244736   ;;  %v380_v57 = vmov 1983009808   ;;  %vm178_vm7 = vcmask 285696  }
  0x1a   :  { %s372_s8 = smov 12   ;;  %s373_s9 = smov 105   ;;  %v201_v58 = vunpack.c.l.s4 %v380_v57  ;;  %vm184_vm8 = vcmask 97280   ;;  %vm180_vm9 = vcmask 572416   ;;  %vm186_vm10 = vcmask 384000  }
  0x1b   :  { %295 = vset.pattern.permute.xlu1 %v359_v3  ;;  %293 = vset.pattern.permute.xlu0 %v360_v4  ;;  %s374_s10 = smov 47   ;;  %s375_s11 = smov 35   ;;  %v204_v63 = vshrl.u32 %v203_v59, 7  ;;  %vm188_vm11 = vcmask 670720   ;;  %vm182_vm12 = vcmask 859136   ;;  %vm190_vm13 = vcmask 957440  }
  0x1c   :  { %54 = vperm.xlu1 %295, %v36_v2   ;;  %44 = vperm.xlu0 %293, %v36_v2   ;;  %s376_s12 = smov 82   ;;  %s377_s13 = smov 70   ;;  %v202_v62 = vunpack.c.0.s8 %v201_v58  ;;  %vm192_vm14 = vcmask 195584   ;;  %vm236_vm15 = vcmask 1041408  }
  0x1d   :  { %s378_s14 = smov 24   ;;  %s379_s15 = smov 117  }
  0x20   :  { %296 = vset.pattern.permute.xlu1 %v361_v5  ;;  %297 = vset.pattern.permute.xlu0 %v362_v6 }
  0x21   :  { %59 = vperm.xlu1 %296, %v36_v2   ;;  %64 = vperm.xlu0 %297, %v36_v2  }
  0x25   :  { %31 = vrot.lane.b32.xlu1 %v29_v7, %s363_s1  ;;  %299 = vset.pattern.permute.xlu0 %v359_v3 }
  0x26   :  { %298 = vset.pattern.permute.xlu1 %v357_v0  ;;  %122 = vperm.xlu0 %299, %v104_v8  }
  0x29   :  { %117 = vperm.xlu1 %298, %v104_v8  }
  0x2a   :  { %301 = vset.pattern.permute.xlu0 %v361_v5 }
  0x2b   :  { %127 = vperm.xlu0 %301, %v104_v8  }
  0x2d   :  { %300 = vset.pattern.permute.xlu1 %v358_v1 }
  0x2e   :  { %107 = vperm.xlu1 %300, %v104_v8  }
  0x2f   :  { %303 = vset.pattern.permute.xlu0 %v362_v6  ;;  %v205_v6 = vsub.s32 %v202_v62, %v204_v63 }
  0x30   :  { %132 = vperm.xlu0 %303, %v104_v8  }
  0x32   :  { %302 = vset.pattern.permute.xlu1 %v360_v4 }
  0x33   :  { %112 = vperm.xlu1 %302, %v104_v8  }
  0x34   :  { %305 = vset.pattern.permute.xlu0 %v364_v9 }
  0x35   :  { %142 = vperm.xlu0 %305, %v104_v8  }
  0x37   :  { %304 = vset.pattern.permute.xlu1 %v365_v10 }
  0x38   :  { %137 = vperm.xlu1 %304, %v104_v8  }
  0x96   :  { %v50_v11 = vpop.permute.xlu1 %49  ;;  %v40_v12 = vpop.permute.xlu0 %39 }
  0x9b   :  { %v55_v13 = vpop.permute.xlu1 %54  ;;  %v45_v14 = vpop.permute.xlu0 %44 }
  0xa0   :  { %v60_v15 = vpop.permute.xlu1 %59  ;;  %v65_v16 = vpop.permute.xlu0 %64 }
  0xa4   :  { %v32_v17 = vpop.permute.xlu1 %31 }
  0xa5   :  { %v35_v18 = vsel %vm34_vm0, 1.0, %v32_v17  ;;  %v123_v28 = vpop.permute.xlu0 %122  ;;  %vm237_vm0 = vcmask 1043458  }
  0xa6   :  { %v67_v19 = vmul.f32 %v65_v16, %v35_v18  ;;  %v42_v20 = vmul.f32 %v40_v12, %v35_v18  ;;  %v47_v21 = vmul.f32 %v45_v14, %v35_v18  ;;  %v52_v22 = vmul.f32 %v50_v11, %v35_v18 }
  0xa7   :  { %v57_v23 = vmul.f32 %v55_v13, %v35_v18  ;;  %v62_v24 = vmul.f32 %v60_v15, %v35_v18 }
  0xa8   :  { %89 = vrot.lane.b32.xlu0 %v67_v19, %s366_s2  ;;  %69 = vrot.lane.b32.xlu1 %v42_v20, %s367_s30  ;;  %v118_v25 = vpop.permute.xlu1 %117 }
  0xaa   :  { %v128_v30 = vpop.permute.xlu0 %127 }
  0xac   :  { %73 = vrot.lane.b32.xlu1 %v47_v21, %s368_s4 }
  0xad   :  { %v108_v26 = vpop.permute.xlu1 %107 }
  0xaf   :  { %v133_v33 = vpop.permute.xlu0 %132 }
  0xb0   :  { %77 = vrot.lane.b32.xlu1 %v52_v22, %s369_s5 }
  0xb2   :  { %v113_v27 = vpop.permute.xlu1 %112 }
  0xb4   :  { %81 = vrot.lane.b32.xlu1 %v57_v23, %s370_s6  ;;  %v143_v35 = vpop.permute.xlu0 %142 }
  0xb7   :  { %v138_v29 = vpop.permute.xlu1 %137 }
  0xb8   :  { %85 = vrot.lane.b32.xlu1 %v62_v24, %s371_s7 }
 0x11a   :  { %v70_v31 = vpop.permute.xlu1 %69  ;;  %v90_v42 = vpop.permute.xlu0 %89 }
 0x11b   :  { %v93_v37 = vsel %vm92_vm1, %v35_v18, %v70_v31  ;;  %vm238_vm1 = vmor %vm237_vm0, %vm236_vm15 }
 0x11e   :  { %v74_v32 = vpop.permute.xlu1 %73 }
 0x11f   :  { %v95_v38 = vsel %vm94_vm2, %v93_v37, %v74_v32  ;;  %vm239_vm2 = vcmask 480260  }
 0x122   :  { %v78_v34 = vpop.permute.xlu1 %77 }
 0x123   :  { %v97_v39 = vsel %vm96_vm3, %v95_v38, %v78_v34  ;;  %vm240_vm3 = vmor %vm239_vm2, %vm238_vm1 }
 0x126   :  { %v82_v36 = vpop.permute.xlu1 %81 }
 0x127   :  { %v99_v40 = vsel %vm98_vm4, %v97_v39, %v82_v36 }
 0x12a   :  { %v86_v41 = vpop.permute.xlu1 %85 }
 0x12b   :  { %v101_v43 = vsel %vm100_vm5, %v99_v40, %v86_v41 }
 0x12c   :  { %v103_v44 = vsel %vm102_vm6, %v101_v43, %v90_v42 }
 0x12d   :  { %v125_v45 = vmul.f32 %v123_v28, %v103_v44  ;;  %v120_v46 = vmul.f32 %v118_v25, %v103_v44  ;;  %v130_v47 = vmul.f32 %v128_v30, %v103_v44  ;;  %v110_v48 = vmul.f32 %v108_v26, %v103_v44 }
 0x12e   :  { %v135_v49 = vmul.f32 %v133_v33, %v103_v44  ;;  %v115_v50 = vmul.f32 %v113_v27, %v103_v44  ;;  %v145_v51 = vmul.f32 %v143_v35, %v103_v44  ;;  %v140_v52 = vmul.f32 %v138_v29, %v103_v44 }
 0x12f   :  { %159 = vrot.lane.b32.xlu0 %v125_v45, %s372_s8  ;;  %155 = vrot.lane.b32.xlu1 %v120_v46, %s373_s9 }
 0x133   :  { %163 = vrot.lane.b32.xlu0 %v130_v47, %s374_s10  ;;  %147 = vrot.lane.b32.xlu1 %v110_v48, %s375_s11 }
 0x137   :  { %167 = vrot.lane.b32.xlu0 %v135_v49, %s376_s12  ;;  %151 = vrot.lane.b32.xlu1 %v115_v50, %s377_s13 }
 0x13b   :  { %175 = vrot.lane.b32.xlu0 %v145_v51, %s378_s14  ;;  %171 = vrot.lane.b32.xlu1 %v140_v52, %s379_s15 }
 0x1a1   :  { %v160_v53 = vpop.permute.xlu0 %159  ;;  %v156_v54 = vpop.permute.xlu1 %155 }
 0x1a2   :  { %v185_v1 = vsel %vm184_vm8, %v156_v54, %v160_v53 }
 0x1a5   :  { %v164_v55 = vpop.permute.xlu0 %163  ;;  %v148_v56 = vpop.permute.xlu1 %147 }
 0x1a6   :  { %v179_v0 = vsel %vm178_vm7, %v103_v44, %v148_v56  ;;  %v187_v3 = vsel %vm186_vm10, %v185_v1, %v164_v55 }
 0x1a9   :  { %v168_v60 = vpop.permute.xlu0 %167  ;;  %v152_v61 = vpop.permute.xlu1 %151 }
 0x1aa   :  { %v181_v2 = vsel %vm180_vm9, %v179_v0, %v152_v61  ;;  %v189_v4 = vsel %vm188_vm11, %v187_v3, %v168_v60 }
 0x1ab   :  { %v183_v8 = vsel %vm182_vm12, %v181_v2, %v156_v54 }
 0x1ad   :  { %v176_v5 = vpop.permute.xlu0 %175  ;;  %v172_v7 = vpop.permute.xlu1 %171 }
 0x1ae   :  { %v191_v9 = vsel %vm190_vm13, %v189_v4, %v172_v7  ;;  %v193_v10 = vsel %vm192_vm14, %v172_v7, %v176_v5 }
 0x1af   :  { %v197_v11 = vcombine.low %v183_v8, %v191_v9  ;;  %v198_v12 = vcombine.high %v183_v8, %v191_v9  ;;  %v199_v13 = vcombine.high %v193_v10, %v193_v10  ;;  %v220_v16 = vrot.slane %v193_v10, %v205_v6 }
 0x1b1   :  { %v206_v14 = vrot.slane %v197_v11, %v205_v6  ;;  %v213_v15 = vrot.slane %v198_v12, %v205_v6  ;;  %v227_v17 = vrot.slane %v199_v13, %v205_v6 }
 0x1b3   :  { %v228_v18 = vcombine.low %v206_v14, %v220_v16  ;;  %v229_v19 = vcombine.high %v206_v14, %v220_v16  ;;  %v230_v20 = vcombine.low %v213_v15, %v227_v17  ;;  %v231_v21 = vcombine.high %v213_v15, %v227_v17 }
 0x1b5   :  { %241 = vst.msk [vmem:[#allocation5] sm:$0x3f] %vm240_vm3, %v228_v18  ;;  %242 = vst.msk [vmem:[#allocation5 + $0x6] sm:$0x3f] %vm240_vm3, %v229_v19 }
 0x1b6   :  { %243 = vst.msk [vmem:[#allocation5 + $0xc] sm:$0x3f] %vm240_vm3, %v230_v20  ;;  %244 = vst.msk [vmem:[#allocation5 + $0x12] sm:$0x3f] %vm240_vm3, %v231_v21 }
 0x1b7   :  { %249 = vsyncadd [#allocation4], 288  ;;  %s381_s16 = smov [#allocation5]  }
 0x1b8   :  { %s250_s17 = sshll.u32 %s381_s16, 4  ;;  %s251_s17 = int_to_ptr.vmem [resolvable:$true] %s250_s17 }
 0x1b9   :  { %s328_s18 = scalar_lea.vmem %s251_s17, 96  ;;  %s332_s19 = scalar_lea.vmem %s251_s17, 384 }
 0x1ba   :  { %p329_p8 = scmp.ne.s32.totalorder %s251_s17, %s328_s18  ;;  %p333_p9 = scmp.lt.s32.totalorder %s251_s17, %s251_s17 }
 0x1bb   :  { %p334_p10 = scmp.lt.s32.totalorder %s332_s19, %s328_s18 }
 0x1bd   :  { %p335_p11 = por %p334_p10, %p333_p9 }
 0x1bf   :  { %p336_p12 = pnand %p335_p11, %p329_p8 }
 0x1c1   :  { %339 = shalt.err (!%p336_p12)
}
 0x1c2   :  { %s340_s22 = scalar_lea.hbm %s437_s3, 96 }
 0x1c3   :  { %p341_p13 = scmp.ne.s32.totalorder %s437_s3, %s340_s22  ;;  %p344_p0 = scmp.lt.u32.totalorder %s340_s22, %s437_s3 }
 0x1c5   :  { %p346_p1 = pnand %p344_p0, %p341_p13 }
 0x1c7   :  { %349 = shalt.err (!%p346_p1)
}
 0x1c8   :  { %s382_s27 = smov 96   ;;  %s383_s28 = smov 6  }
 0x1c9   :  { %256 = dma.vmem_to_hbm [thread:$0]  %s251_s17, 96, %s437_s3, [#allocation4], %s382_s27, %s382_s27, %s383_s28  }
 0x1ca   :  { %352 = dma.done.wait [#allocation4], 384  }
 0x1cb   :  { %353 = vsyncadd [#allocation4], 4294966912 }
 0x1cc   :  { %260 = vsyncpa [#allocation3], 1 }
 0x1cd   :  { %261 = vsyncpa [#allocation4], 1 }

</bundles_post_ra>
